<compile_context>
chip_gen: v5e
topology: v5e:2x2
jax: 0.10.0
libtpu: 0.0.40
codegen_flags: <defaults>
</compile_context>

<pallas_src>
import jax
import jax.numpy as jnp
from jax.experimental import pallas as pl
from jax.experimental.pallas import tpu as pltpu


LANE = 128  # TPU lane width: feature dims padded up to multiples of this
NEG_BIG = -1e30  # baked into padded logits lanes so log-softmax ignores them


def _round_up(n, m):
    return (n + m - 1) // m * m


def _pick_tile_b(batch):
    # >=2 parallel tiles for v7x's 2 TCs at moderate B; 256-row MXU fill for big B.
    return 256 if batch >= 512 else 128


def _make_kernel(h_pad, d_out_pad):
    """Kernel closes over Python ints only (no traced constants)."""

    def kernel(x_ref, w1_ref, w2_ref, w3_ref, w4_ref, w5_ref, b_ref, o_ref):
        # 5 bf16 MXU matmuls with f32 accumulation, VPU ReLUs, EUP exp/log.
        b = b_ref[...]                       # f32 [8, BW] packed biases
        h = x_ref[...]                       # bf16 [TILE_B, D_IN_PAD]

        h = jnp.dot(h, w1_ref[...], preferred_element_type=jnp.float32)
        h = jnp.maximum(h + b[0:1, :h_pad], 0.0).astype(jnp.bfloat16)

        h = jnp.dot(h, w2_ref[...], preferred_element_type=jnp.float32)
        h = jnp.maximum(h + b[1:2, :h_pad], 0.0).astype(jnp.bfloat16)

        h = jnp.dot(h, w3_ref[...], preferred_element_type=jnp.float32)
        h = jnp.maximum(h + b[2:3, :h_pad], 0.0).astype(jnp.bfloat16)

        h = jnp.dot(h, w4_ref[...], preferred_element_type=jnp.float32)
        h = jnp.maximum(h + b[3:4, :h_pad], 0.0).astype(jnp.bfloat16)

        logits = jnp.dot(h, w5_ref[...], preferred_element_type=jnp.float32)
        # Padded weight columns are zero, so padded logits == bias == -1e30:
        # the softmax mask comes for free from the packed bias row.
        logits = logits + b[4:5, :d_out_pad]

        m = jnp.max(logits, axis=-1, keepdims=True)
        z = logits - m
        lse = jnp.log(jnp.sum(jnp.exp(z), axis=-1, keepdims=True))
        o_ref[...] = z - lse                 # lane-dense (128-wide) f32 store

    return kernel


def prepare_params(params, d_in, d_hidden, d_out):
    """One-time prep (call at init, NOT per forward): pad feature dims to 128
    lanes, cast weights to bf16, pack the five biases into one (8, 128) f32 tile
    with -1e30 baked into the padded lanes of the layer-5 bias row."""
    d_in_p = _round_up(d_in, LANE)
    h_p = _round_up(d_hidden, LANE)
    d_out_p = _round_up(d_out, LANE)
    bw = max(h_p, d_out_p)

    def pad_w(w, rows, cols):
        out = jnp.zeros((rows, cols), jnp.float32)
        out = out.at[: w.shape[0], : w.shape[1]].set(w)
        return out.astype(jnp.bfloat16)

    kp = {
        "w1": pad_w(params["w1"], d_in_p, h_p),
        "w2": pad_w(params["w2"], h_p, h_p),
        "w3": pad_w(params["w3"], h_p, h_p),
        "w4": pad_w(params["w4"], h_p, h_p),
        "w5": pad_w(params["w5"], h_p, d_out_p),
    }
    b_all = jnp.zeros((8, bw), jnp.float32)
    for i in range(1, 5):
        b = params[f"b{i}"][0]
        b_all = b_all.at[i - 1, : b.shape[0]].set(b)
    # Layer-5 bias row: real biases in [:d_out], -1e30 in the padded lanes so the
    # log-softmax normalizes only over the real classes (PyTorch LogSoftmax(dim=1)).
    b5_row = jnp.full((bw,), NEG_BIG, jnp.float32)
    b5_row = b5_row.at[:d_out].set(params["b5"][0])
    b_all = b_all.at[4].set(b5_row)
    kp["b_all"] = b_all

    dims = dict(d_in=d_in, d_hidden=d_hidden, d_out=d_out,
                d_in_p=d_in_p, h_p=h_p, d_out_p=d_out_p, bw=bw)
    return kp, dims


def net_class_forward(x, kp, dims):
    """x: [B, d_in] f32. kp/dims: output of prepare_params (prepped once)."""
    B, d_in = x.shape
    d_in_p, h_p, d_out_p, bw = dims["d_in_p"], dims["h_p"], dims["d_out_p"], dims["bw"]
    d_out = dims["d_out"]

    tile_b = _pick_tile_b(B)
    b_pad = _round_up(B, tile_b)
    x_p = jnp.zeros((b_pad, d_in_p), jnp.float32).at[:B, :d_in].set(x)
    x_p = x_p.astype(jnp.bfloat16)
    # TODO(synk): for large B, feed d_in unpadded ((tile_b, d_in) block with full
    # last dim) and/or store a bf16 output block to cut padded HBM traffic further.

    kernel = _make_kernel(h_p, d_out_p)

    weight_bytes = 2 * (d_in_p * h_p + 3 * h_p * h_p + h_p * d_out_p) + 4 * 8 * bw
    cost = pl.CostEstimate(
        flops=2 * b_pad * (d_in_p * h_p + 3 * h_p * h_p + h_p * d_out_p),
        transcendentals=b_pad * (d_out_p + 1),
        bytes_accessed=b_pad * d_in_p * 2 + b_pad * d_out_p * 4 + weight_bytes,
    )

    out = pl.pallas_call(
        kernel,
        out_shape=jax.ShapeDtypeStruct((b_pad, d_out_p), jnp.float32),
        grid=(b_pad // tile_b,),
        in_specs=[
            pl.BlockSpec((tile_b, d_in_p), lambda i: (i, 0)),   # x: batch-tiled, pipelined
            pl.BlockSpec((d_in_p, h_p), lambda i: (0, 0)),      # weights: VMEM-resident
            pl.BlockSpec((h_p, h_p), lambda i: (0, 0)),
            pl.BlockSpec((h_p, h_p), lambda i: (0, 0)),
            pl.BlockSpec((h_p, h_p), lambda i: (0, 0)),
            pl.BlockSpec((h_p, d_out_p), lambda i: (0, 0)),
            pl.BlockSpec((8, bw), lambda i: (0, 0)),            # packed biases: one DMA
        ],
        out_specs=pl.BlockSpec((tile_b, d_out_p), lambda i: (i, 0)),
        compiler_params=pltpu.CompilerParams(
            dimension_semantics=("parallel",)),                 # shard batch over v7x's 2 TCs
        cost_estimate=cost,
    )(x_p, kp["w1"], kp["w2"], kp["w3"], kp["w4"], kp["w5"], kp["b_all"])

    return out[:B, :d_out]


def init_params(key, d_in, d_hidden, d_out):
    """torch.nn.Linear-style init (uniform +-1/sqrt(fan_in)); weights stored [in, out]."""
    dims = [(d_in, d_hidden), (d_hidden, d_hidden), (d_hidden, d_hidden),
            (d_hidden, d_hidden), (d_hidden, d_out)]
    params = {}
    for i, (fan_in, fan_out) in enumerate(dims, start=1):
        key, kw, kb = jax.random.split(key, 3)
        bound = 1.0 / jnp.sqrt(fan_in)
        params[f"w{i}"] = jax.random.uniform(
            kw, (fan_in, fan_out), jnp.float32, -bound, bound)
        params[f"b{i}"] = jax.random.uniform(
            kb, (1, fan_out), jnp.float32, -bound, bound)
    return params


def reference_forward(x, params):
    """Pure-JAX reference reproducing the kernel's mixed precision:
    bf16 weights/activations on the matmul inputs, f32 accumulation and bias/softmax."""
    q = lambda a: a.astype(jnp.bfloat16).astype(jnp.float32)
    h = q(x)
    for i in range(1, 5):
        h = jnp.maximum(h @ q(params[f"w{i}"]) + params[f"b{i}"], 0.0)
        h = q(h)
    logits = h @ q(params["w5"]) + params["b5"]
    return jax.nn.log_softmax(logits, axis=1)


if __name__ == "__main__":
    B, d_in, d_hidden, d_out = 256, 32, 32, 16

    key = jax.random.PRNGKey(0)
    key, kx = jax.random.split(key)
    x = jax.random.normal(kx, (B, d_in), jnp.float32)
    params = init_params(key, d_in, d_hidden, d_out)

    # One-time parameter prep (hoisted out of the per-call forward).
    kp, dims = prepare_params(params, d_in, d_hidden, d_out)

    out = net_class_forward(x, kp, dims)
    out = jax.block_until_ready(out)

    ref = reference_forward(x, params)
    assert out.shape == (B, d_out)
    assert jnp.allclose(out, ref, atol=1e-4, rtol=1e-4), "mismatch vs JAX reference"

    print("KERNEL_OK")
</pallas_src>

<mosaic_0001>
module attributes {stable_mosaic.version = 11 : i64} {
  func.func @kernel(%arg0: i32, %arg1: memref<128x128xbf16, #tpu.memory_space<vmem>>, %arg2: memref<128x128xbf16, #tpu.memory_space<vmem>>, %arg3: memref<128x128xbf16, #tpu.memory_space<vmem>>, %arg4: memref<128x128xbf16, #tpu.memory_space<vmem>>, %arg5: memref<128x128xbf16, #tpu.memory_space<vmem>>, %arg6: memref<128x128xbf16, #tpu.memory_space<vmem>>, %arg7: memref<8x128xf32, #tpu.memory_space<vmem>>, %arg8: memref<128x128xf32, #tpu.memory_space<vmem>>) attributes {dimension_semantics = [#tpu.dimension_semantics<parallel>], iteration_bounds = array<i64: 2>, scalar_prefetch = 0 : i64, scratch_operands = 0 : i64, tpu.core_type = #tpu.core_type<tc>, window_params = [{transform_indices = @transform_0, window_bounds = array<i64: 128, 128>}, {pipeline_mode = #tpu.pipeline_mode<synchronous>, transform_indices = @transform_1, window_bounds = array<i64: 128, 128>}, {pipeline_mode = #tpu.pipeline_mode<synchronous>, transform_indices = @transform_2, window_bounds = array<i64: 128, 128>}, {pipeline_mode = #tpu.pipeline_mode<synchronous>, transform_indices = @transform_3, window_bounds = array<i64: 128, 128>}, {pipeline_mode = #tpu.pipeline_mode<synchronous>, transform_indices = @transform_4, window_bounds = array<i64: 128, 128>}, {pipeline_mode = #tpu.pipeline_mode<synchronous>, transform_indices = @transform_5, window_bounds = array<i64: 128, 128>}, {pipeline_mode = #tpu.pipeline_mode<synchronous>, transform_indices = @transform_6, window_bounds = array<i64: 8, 128>}, {transform_indices = @transform_7, window_bounds = array<i64: 128, 128>}]} {
    %c0 = arith.constant 0 : index
    %c0_0 = arith.constant 0 : index
    %0 = vector.load %arg7[%c0, %c0_0] : memref<8x128xf32, #tpu.memory_space<vmem>>, vector<8x128xf32>
    %c0_1 = arith.constant 0 : index
    %c0_2 = arith.constant 0 : index
    %1 = vector.load %arg1[%c0_1, %c0_2] : memref<128x128xbf16, #tpu.memory_space<vmem>>, vector<128x128xbf16>
    %c0_3 = arith.constant 0 : index
    %c0_4 = arith.constant 0 : index
    %2 = vector.load %arg2[%c0_3, %c0_4] : memref<128x128xbf16, #tpu.memory_space<vmem>>, vector<128x128xbf16>
    %cst = arith.constant dense<0.000000e+00> : vector<128x128xf32>
    %3 = tpu.matmul %1, %2, %cst {dimension_numbers = #tpu.dot_dimension_numbers<[1], [0], [0], [1], [0, 0, 1, 1], [], []>} : vector<128x128xbf16>, vector<128x128xbf16>, vector<128x128xf32> -> vector<128x128xf32>
    %4 = vector.extract_strided_slice %0 {offsets = [0, 0], sizes = [1, 128], strides = [1, 1]} : vector<8x128xf32> to vector<1x128xf32>
    %5 = vector.broadcast %4 : vector<1x128xf32> to vector<128x128xf32>
    %6 = arith.addf %3, %5 : vector<128x128xf32>
    %cst_5 = arith.constant 0.000000e+00 : f32
    %7 = vector.broadcast %cst_5 : f32 to vector<128x128xf32>
    %8 = arith.maximumf %6, %7 : vector<128x128xf32>
    %9 = arith.truncf %8 : vector<128x128xf32> to vector<128x128xbf16>
    %c0_6 = arith.constant 0 : index
    %c0_7 = arith.constant 0 : index
    %10 = vector.load %arg3[%c0_6, %c0_7] : memref<128x128xbf16, #tpu.memory_space<vmem>>, vector<128x128xbf16>
    %cst_8 = arith.constant dense<0.000000e+00> : vector<128x128xf32>
    %11 = tpu.matmul %9, %10, %cst_8 {dimension_numbers = #tpu.dot_dimension_numbers<[1], [0], [0], [1], [0, 0, 1, 1], [], []>} : vector<128x128xbf16>, vector<128x128xbf16>, vector<128x128xf32> -> vector<128x128xf32>
    %12 = vector.extract_strided_slice %0 {offsets = [1, 0], sizes = [1, 128], strides = [1, 1]} : vector<8x128xf32> to vector<1x128xf32>
    %13 = vector.broadcast %12 : vector<1x128xf32> to vector<128x128xf32>
    %14 = arith.addf %11, %13 : vector<128x128xf32>
    %cst_9 = arith.constant 0.000000e+00 : f32
    %15 = vector.broadcast %cst_9 : f32 to vector<128x128xf32>
    %16 = arith.maximumf %14, %15 : vector<128x128xf32>
    %17 = arith.truncf %16 : vector<128x128xf32> to vector<128x128xbf16>
    %c0_10 = arith.constant 0 : index
    %c0_11 = arith.constant 0 : index
    %18 = vector.load %arg4[%c0_10, %c0_11] : memref<128x128xbf16, #tpu.memory_space<vmem>>, vector<128x128xbf16>
    %cst_12 = arith.constant dense<0.000000e+00> : vector<128x128xf32>
    %19 = tpu.matmul %17, %18, %cst_12 {dimension_numbers = #tpu.dot_dimension_numbers<[1], [0], [0], [1], [0, 0, 1, 1], [], []>} : vector<128x128xbf16>, vector<128x128xbf16>, vector<128x128xf32> -> vector<128x128xf32>
    %20 = vector.extract_strided_slice %0 {offsets = [2, 0], sizes = [1, 128], strides = [1, 1]} : vector<8x128xf32> to vector<1x128xf32>
    %21 = vector.broadcast %20 : vector<1x128xf32> to vector<128x128xf32>
    %22 = arith.addf %19, %21 : vector<128x128xf32>
    %cst_13 = arith.constant 0.000000e+00 : f32
    %23 = vector.broadcast %cst_13 : f32 to vector<128x128xf32>
    %24 = arith.maximumf %22, %23 : vector<128x128xf32>
    %25 = arith.truncf %24 : vector<128x128xf32> to vector<128x128xbf16>
    %c0_14 = arith.constant 0 : index
    %c0_15 = arith.constant 0 : index
    %26 = vector.load %arg5[%c0_14, %c0_15] : memref<128x128xbf16, #tpu.memory_space<vmem>>, vector<128x128xbf16>
    %cst_16 = arith.constant dense<0.000000e+00> : vector<128x128xf32>
    %27 = tpu.matmul %25, %26, %cst_16 {dimension_numbers = #tpu.dot_dimension_numbers<[1], [0], [0], [1], [0, 0, 1, 1], [], []>} : vector<128x128xbf16>, vector<128x128xbf16>, vector<128x128xf32> -> vector<128x128xf32>
    %28 = vector.extract_strided_slice %0 {offsets = [3, 0], sizes = [1, 128], strides = [1, 1]} : vector<8x128xf32> to vector<1x128xf32>
    %29 = vector.broadcast %28 : vector<1x128xf32> to vector<128x128xf32>
    %30 = arith.addf %27, %29 : vector<128x128xf32>
    %cst_17 = arith.constant 0.000000e+00 : f32
    %31 = vector.broadcast %cst_17 : f32 to vector<128x128xf32>
    %32 = arith.maximumf %30, %31 : vector<128x128xf32>
    %33 = arith.truncf %32 : vector<128x128xf32> to vector<128x128xbf16>
    %c0_18 = arith.constant 0 : index
    %c0_19 = arith.constant 0 : index
    %34 = vector.load %arg6[%c0_18, %c0_19] : memref<128x128xbf16, #tpu.memory_space<vmem>>, vector<128x128xbf16>
    %cst_20 = arith.constant dense<0.000000e+00> : vector<128x128xf32>
    %35 = tpu.matmul %33, %34, %cst_20 {dimension_numbers = #tpu.dot_dimension_numbers<[1], [0], [0], [1], [0, 0, 1, 1], [], []>} : vector<128x128xbf16>, vector<128x128xbf16>, vector<128x128xf32> -> vector<128x128xf32>
    %36 = vector.extract_strided_slice %0 {offsets = [4, 0], sizes = [1, 128], strides = [1, 1]} : vector<8x128xf32> to vector<1x128xf32>
    %37 = vector.broadcast %36 : vector<1x128xf32> to vector<128x128xf32>
    %38 = arith.addf %35, %37 : vector<128x128xf32>
    %cst_21 = arith.constant dense<0xFF800000> : vector<128xf32>
    %39 = vector.multi_reduction <maximumf>, %38, %cst_21 [1] : vector<128x128xf32> to vector<128xf32>
    %40 = vector.shape_cast %39 : vector<128xf32> to vector<128x1xf32>
    %41 = vector.broadcast %40 : vector<128x1xf32> to vector<128x128xf32>
    %42 = arith.subf %38, %41 : vector<128x128xf32>
    %43 = math.exp %42 : vector<128x128xf32>
    %cst_22 = arith.constant dense<0.000000e+00> : vector<128xf32>
    %44 = vector.multi_reduction <add>, %43, %cst_22 [1] : vector<128x128xf32> to vector<128xf32>
    %45 = vector.shape_cast %44 : vector<128xf32> to vector<128x1xf32>
    %46 = math.log %45 : vector<128x1xf32>
    %47 = vector.broadcast %46 : vector<128x1xf32> to vector<128x128xf32>
    %48 = arith.subf %42, %47 : vector<128x128xf32>
    %c0_23 = arith.constant 0 : index
    %c0_24 = arith.constant 0 : index
    %49 = vector.load %arg8[%c0_23, %c0_24] : memref<128x128xf32, #tpu.memory_space<vmem>>, vector<128x128xf32>
    tpu.vector_store %arg8[%c0_23, %c0_24], %48 {strides = array<i32>} : memref<128x128xf32, #tpu.memory_space<vmem>>, vector<128x128xf32>,
    return
  }
  func.func @transform_0(%arg0: i32) -> (i32, i32) {
    %c0_i32 = arith.constant 0 : i32
    %c0_i32_0 = arith.constant 0 : i32
    return %arg0, %c0_i32 : i32, i32
  }
  func.func @transform_1(%arg0: i32) -> (i32, i32) {
    %c0_i32 = arith.constant 0 : i32
    %c0_i32_0 = arith.constant 0 : i32
    %c0_i32_1 = arith.constant 0 : i32
    return %c0_i32, %c0_i32_0 : i32, i32
  }
  func.func @transform_2(%arg0: i32) -> (i32, i32) {
    %c0_i32 = arith.constant 0 : i32
    %c0_i32_0 = arith.constant 0 : i32
    %c0_i32_1 = arith.constant 0 : i32
    return %c0_i32, %c0_i32_0 : i32, i32
  }
  func.func @transform_3(%arg0: i32) -> (i32, i32) {
    %c0_i32 = arith.constant 0 : i32
    %c0_i32_0 = arith.constant 0 : i32
    %c0_i32_1 = arith.constant 0 : i32
    return %c0_i32, %c0_i32_0 : i32, i32
  }
  func.func @transform_4(%arg0: i32) -> (i32, i32) {
    %c0_i32 = arith.constant 0 : i32
    %c0_i32_0 = arith.constant 0 : i32
    %c0_i32_1 = arith.constant 0 : i32
    return %c0_i32, %c0_i32_0 : i32, i32
  }
  func.func @transform_5(%arg0: i32) -> (i32, i32) {
    %c0_i32 = arith.constant 0 : i32
    %c0_i32_0 = arith.constant 0 : i32
    %c0_i32_1 = arith.constant 0 : i32
    return %c0_i32, %c0_i32_0 : i32, i32
  }
  func.func @transform_6(%arg0: i32) -> (i32, i32) {
    %c0_i32 = arith.constant 0 : i32
    %c0_i32_0 = arith.constant 0 : i32
    %c0_i32_1 = arith.constant 0 : i32
    return %c0_i32, %c0_i32_0 : i32, i32
  }
  func.func @transform_7(%arg0: i32) -> (i32, i32) {
    %c0_i32 = arith.constant 0 : i32
    %c0_i32_0 = arith.constant 0 : i32
    return %arg0, %c0_i32 : i32, i32
  }
}

</mosaic_0001>

<bundles_post_ra>
// kernel: tpu_custom_call.1
= control target key start
LH: loop header
LB: loop body
LE: loop exit
PB: predicated region body
PF: predicated region fallthrough
CT: control target
= control target key end

     0   :  { %s2652_s0 = inlined_call_operand.hbm [shape: bf16[256,128], index: 0, kind: input, shape index: {}]   ;;  %s2653_s1 = inlined_call_operand.hbm [shape: bf16[128,128], index: 1, kind: input, shape index: {}]   ;;  %s2654_s2 = inlined_call_operand.hbm [shape: bf16[128,128], index: 2, kind: input, shape index: {}]   ;;  %s2655_s3 = inlined_call_operand.hbm [shape: bf16[128,128], index: 3, kind: input, shape index: {}]   ;;  %s2656_s4 = inlined_call_operand.hbm [shape: bf16[128,128], index: 4, kind: input, shape index: {}]   ;;  %s2657_s5 = inlined_call_operand.hbm [shape: bf16[128,128], index: 5, kind: input, shape index: {}]   ;;  %s2658_s6 = inlined_call_operand.hbm [shape: f32[8,128], index: 6, kind: input, shape index: {}]   ;;  %s2659_s7 = inlined_call_operand.hbm [shape: f32[256,128], index: 7, kind: output, shape index: {}]  }
   0x1   :  { %2662 = sst [smem:[#allocation20_spill]] %s2653_s1 }
   0x2   :  { %2663 = sst [smem:[#allocation21_spill]] %s2654_s2 }
   0x3   :  { %12 = vsyncpa [#allocation3], 0 }
   0x4   :  { %14 = vsyncpa [#allocation3 + $0x1], 0 }
   0x5   :  { %15 = vsyncpa [#allocation6], 0 }
   0x6   :  { %16 = vsyncpa [#allocation9], 0 }
   0x7   :  { %17 = vsyncpa [#allocation12], 0 }
   0x8   :  { %18 = vsyncpa [#allocation4], 0 }
   0x9   :  { %20 = vsyncpa [#allocation4 + $0x1], 0  ;;  %s2258_s24 = smov 0   ;;  %s2260_s25 = smov 0  }
   0xa   :  { %s2262_s26 = smov 0   ;;  %s2264_s27 = smov 0  }
   0xb LB: > { %s2664_s1 = sld [smem:[#allocation20_spill]]  ;;  %s2282_s8 = sadd.s32 4294967295, %s2206_s27   ;;  %s2206_s27 = sphi %s2264_s27, %s2679_s27   ;;  %s2202_s26 = sphi %s2262_s26, %s2678_s26   ;;  %s2198_s25 = sphi %s2260_s25, %s2677_s25   ;;  %s2194_s24 = sphi %s2258_s24, %s2676_s24  }
   0xc   : > { %p1452_p0 = scmp.ge.s32.totalorder %s2206_s27, 1  ;;  %p47_p1 = scmp.eq.s32.totalorder %s2282_s8, 0 }
   0xd   : > { %p209_p2 = scmp.lt.s32.totalorder %s2206_s27, 3  ;;  %s2208_s10 = smov [#allocation5]  }
   0xe   : > { %s222_s11 = sshll.u32 %s2208_s10, 4  ;;  %s248_s14 = sshll.u32 %s2655_s3, 4  ;;  %s223_s11 = int_to_ptr.vmem [resolvable:$true] %s222_s11  ;;  %s249_s14 = int_to_ptr.hbm [resolvable:$true] %s248_s14 }
   0xf   : > { %p2287_p3 = pnand %p1452_p0, %p209_p2  ;;  %s276_s18 = sshll.u32 %s2657_s5, 4  ;;  %s277_s18 = int_to_ptr.hbm [resolvable:$true] %s276_s18 }
  0x10   : > { %s2209_s19 = smov [#allocation8]   ;;  %s2660_s21 = smov 64  }
  0x11   : > { %s220_s30 = sshll.u32 %s2664_s1, 4  ;;  %p1771_p4 = pneg %p2287_p3  ;;  %s221_s30 = int_to_ptr.hbm [resolvable:$true] %s220_s30 }
  0x12   : > { %s250_s20 = sshll.u32 %s2209_s19, 4  ;;  %s2661_s22 = smov 4   ;;  %s251_s20 = int_to_ptr.vmem [resolvable:$true] %s250_s20 }
  0x13   : > { %p2299_p6 = pnand %p1771_p4, %p47_p1  ;;  %s2667_s2 = sld [smem:[#allocation21_spill]] }
  0x14   : > { %s2212_s10 = smov [#allocation11]   ;;  %s262_s16 = sshll.u32 %s2656_s4, 4  ;;  %s263_s16 = int_to_ptr.hbm [resolvable:$true] %s262_s16 }
  0x15   : > { %1774 = dma.hbm_to_vmem [thread:$0]  (!%p2299_p6), %s221_s30, 1024, %s223_s11, [#allocation6], %s2660_s21, %s2660_s21, %s2661_s22  }
  0x16   : > { %1780 = dma.hbm_to_vmem [thread:$0]  (!%p2299_p6), %s249_s14, 1024, %s251_s20, [#allocation9], %s2660_s21, %s2660_s21, %s2661_s22  }
  0x17   : > { %s278_s12 = sshll.u32 %s2212_s10, 4  ;;  %s2213_s30 = smov [#allocation7]   ;;  %s279_s12 = int_to_ptr.vmem [resolvable:$true] %s278_s12 }
  0x18   : > { %1786 = dma.hbm_to_vmem [thread:$0]  (!%p2299_p6), %s277_s18, 1024, %s279_s12, [#allocation12], %s2660_s21, %s2660_s21, %s2661_s22  }
  0x19   : > { %s234_s29 = sshll.u32 %s2667_s2, 4  ;;  %s236_s11 = sshll.u32 %s2213_s30, 4  ;;  %s235_s29 = int_to_ptr.hbm [resolvable:$true] %s234_s29  ;;  %s237_s11 = int_to_ptr.vmem [resolvable:$true] %s236_s11 }
  0x1a   : > { %1777 = dma.hbm_to_vmem [thread:$0]  (!%p2299_p6), %s235_s29, 1024, %s237_s11, [#allocation6], %s2660_s21, %s2660_s21, %s2661_s22  }
  0x1b   : > { %s291_s19 = sshll.u32 %s2658_s6, 4  ;;  %s2214_s20 = smov [#allocation10]   ;;  %s292_s19 = int_to_ptr.hbm [resolvable:$true] %s291_s19 }
  0x1c   : > { %s264_s23 = sshll.u32 %s2214_s20, 4  ;;  %s2215_s28 = smov [#allocation13]   ;;  %s265_s23 = int_to_ptr.vmem [resolvable:$true] %s264_s23 }
  0x1d   : > { %1783 = dma.hbm_to_vmem [thread:$0]  (!%p2299_p6), %s263_s16, 1024, %s265_s23, [#allocation9], %s2660_s21, %s2660_s21, %s2661_s22  }
  0x1e   : > { %s293_s29 = sshll.u32 %s2215_s28, 4  ;;  %s1451_s10 = sadd.s32 4294967294, %s2206_s27   ;;  %s294_s29 = int_to_ptr.vmem [resolvable:$true] %s293_s29 }
  0x1f   : > { %1789 = dma.hbm_to_vmem [thread:$0]  (!%p2299_p6), %s292_s19, 128, %s294_s29, [#allocation12]  }
  0x20   : > { %s2344_s12 = sadd.s32 1, %s2206_s27   ;;  %s33_s11 = sadd.s32 1, %s2202_s26 }
  0x21   : > { %s30_s30 = ssub.s32 %s2206_s27, %s2344_s12  ;;  %p40_p8 = scmp.ne.s32.totalorder %s2202_s26, %s2198_s25 }
  0x22   : > { %p31_p7 = scmp.eq.s32.totalorder %s30_s30, 0  ;;  %p41_p9 = scmp.eq.s32.totalorder %s2206_s27, 0 }
  0x23   : > { %p46_p10 = scmp.ne.s32.totalorder %s2198_s25, %s2194_s24  ;;  %p196_p13 = scmp.eq.s32.totalorder %s2282_s8, 1 }
  0x24   : > { %s2355_s13 = scalar_select %p31_p7, %s2202_s26, %s33_s11  }
  0x25   : > { %p2357_p11 = por %p41_p9, %p40_p8  ;;  %p2363_p12 = por %p47_p1, %p46_p10 }
  0x26   : > { %p202_p0 = scmp.eq.s32.totalorder %s1451_s10, 1  ;;  %p1804_p2 = scmp.lt.s32.totalorder %s2206_s27, 2 }
  0x27   : > { %s304_s16 = sand.u32 1, %s2202_s26   ;;  %p2370_p4 = por %p196_p13, %p40_p8 }
  0x28   : > { %p2374_p6 = por %p202_p0, %p46_p10  ;;  %s1460_s19 = sshll.u32 %s304_s16, 6 }
  0x29   : > { %s1669_s20 = sshll.u32 %s2206_s27, 6  ;;  %s308_s30 = scalar_lea.vmem [#allocation2], %s1460_s19 }
  0x2a   : > { %s313_s29 = scalar_lea.hbm %s2652_s0, %s1669_s20  ;;  %s316_s11 = sshll.u32 %s308_s30, 4  ;;  %s317_s11 = int_to_ptr.vmem [resolvable:$true] %s316_s11 }
  0x2b   : > { %s314_s21 = sshll.u32 %s313_s29, 4  ;;  %p2384_p7 = pnand %p1804_p2, %p2357_p11  ;;  %s315_s21 = int_to_ptr.hbm [resolvable:$true] %s314_s21 }
  0x2c   : > { %s305_s22 = scalar_lea.sflag [#allocation3], %s304_s16  ;;  %s2098_s1 = sshra.s32 %s315_s21, 4  ;;  %s2099_s1 = int_to_ptr.hbm [resolvable:$true] %s2098_s1 }
  0x2d   : > { %s2100_s2 = scalar_lea.hbm %s2099_s1, 64  ;;  %p2102_p9 = pneg %p2384_p7 }
  0x2e   : > { %p2101_p8 = scmp.ne.s32.totalorder %s2099_s1, %s2100_s2  ;;  %s2105_s23 = scalar_lea.hbm %s2652_s0, 128 }
  0x2f   : > { %p2106_p11 = scmp.lt.s32.totalorder %s2099_s1, %s2652_s0  ;;  %p2107_p0 = scmp.lt.s32.totalorder %s2105_s23, %s2100_s2 }
  0x30   : > { %p2103_p10 = pnand %p2102_p9, %p2101_p8 }
  0x31   : > { %p2108_p2 = por %p2107_p0, %p2106_p11 }
  0x32   : > { %p2104_p13 = pneg %p2103_p10 }
  0x34   : > { %p2109_p5 = pnand %p2108_p2, %p2104_p13 }
  0x36   : > { %2112 = shalt.err (!%p2109_p5)
}
  0x37   : > { %s2673_s16 = smov 4   ;;  %s2674_s29 = smov 64  }
  0x38   : > { %1793 = dma.hbm_to_vmem [thread:$0]  (!%p2384_p7), %s315_s21, 1024, %s317_s11, %s305_s22, %s2674_s29, %s2674_s29, %s2673_s16  }
  0x39   : > { %328 = sbr.rel (%p2287_p3) target bundleno = 1179 (0x49b), region = 48  ;;  %s2404_s30 = sand.u32 (!%p2287_p3), 1, %s2198_s25  }
  0x3a   : > { %s1464_s1 = sshll.u32 (!%p2287_p3), %s2404_s30, 6  ;;  %s331_s2 = scalar_lea.sflag (!%p2287_p3), [#allocation3], %s2404_s30 }
  0x3b   : > { %s2408_s19 = scalar_lea.vmem (!%p2287_p3), [#allocation2], %s1464_s1 }
  0x3e   : > { %2173 = dma.done.wait (%p2363_p12), %s331_s2, 1024  }
  0x3f   : > { %2175 = vsyncadd (%p2363_p12), %s331_s2, 4294966272 }
  0x40   : > { %2177 = dma.done.wait (%p47_p1), [#allocation6], 2048  }
  0x41   : > { %2179 = vsyncadd (%p47_p1), [#allocation6], 4294965248 }
  0x42   : > { %2181 = dma.done.wait (%p47_p1), [#allocation9], 2048  }
  0x43   : > { %2183 = vsyncadd (%p47_p1), [#allocation9], 4294965248 }
  0x44   : > { %2185 = dma.done.wait (%p47_p1), [#allocation12], 1152  }
  0x45   : > { %2187 = vsyncadd (%p47_p1), [#allocation12], 4294966144  ;;  %v1685_v0 = vld [vmem:[#allocation5 + $0x38] sm:$0xff]  ;;  %v1684_v1 = vld [vmem:[#allocation5 + $0x30] sm:$0xff]  ;;  %s1471_s9 = sshll.u32 %s2404_s30, 7  ;;  %s1718_s22 = sshll.u32 %s2282_s8, 7 }
  0x46   : > { %528 = vmatpush.bf16.msra.mxu0 %v1685_v0  ;;  %1719 = vmatpush.bf16.msra.mxu1 %v1685_v0  ;;  %v1683_v2 = vld [vmem:[#allocation5 + $0x28] sm:$0xff]  ;;  %v1682_v3 = vld [vmem:[#allocation5 + $0x20] sm:$0xff]  ;;  %v1681_v4 = vld [vmem:[#allocation5 + $0x18] sm:$0xff]  ;;  %s2585_s21 = scalar_lea.vmem [#allocation14], %s1471_s9  ;;  %s1317_s10 = scalar_lea.hbm %s2659_s7, %s1718_s22 }
  0x47   : > { %1720 = vmatpush.bf16.msra.mxu2 %v1685_v0  ;;  %1721 = vmatpush.bf16.msra.mxu3 %v1685_v0  ;;  %v1680_v5 = vld [vmem:[#allocation5 + $0x10] sm:$0xff]  ;;  %v1679_v6 = vld [vmem:[#allocation5 + $0x8] sm:$0xff]  ;;  %v1678_v7 = vld [vmem:[#allocation5] sm:$0xff]  ;;  %s1318_s20 = sshll.u32 %s2585_s21, 4  ;;  %s1320_s23 = sshll.u32 %s1317_s10, 4  ;;  %s1319_s20 = int_to_ptr.vmem [resolvable:$true] %s1318_s20  ;;  %s1321_s23 = int_to_ptr.hbm [resolvable:$true] %s1320_s23 }
  0x48   : > { %v1693_v8 = vld [vmem:[#allocation7 + $0x38] sm:$0xff]  ;;  %v1670_v9 = vld [vmem:[%s2408_s19] sm:$0xff]  ;;  %v1672_v10 = vld [vmem:[%s2408_s19 + $0x10] sm:$0xff]  ;;  %s1306_s28 = scalar_lea.sflag [#allocation4], %s2404_s30  ;;  %s2142_s8 = sshra.s32 %s1321_s23, 4  ;;  %s2143_s8 = int_to_ptr.hbm [resolvable:$true] %s2142_s8 }
  0x49   : > { %v1674_v11 = vld [vmem:[%s2408_s19 + $0x20] sm:$0xff]  ;;  %v1676_v12 = vld [vmem:[%s2408_s19 + $0x30] sm:$0xff]  ;;  %v1691_v14 = vld [vmem:[#allocation7 + $0x28] sm:$0xff]  ;;  %s2144_s14 = scalar_lea.hbm %s2143_s8, 128  ;;  %s2148_s1 = scalar_lea.hbm %s2659_s7, 256 }
  0x4a   : > { %529 = vmatpush.bf16.msra.mxu0 %v1684_v1  ;;  %1722 = vmatpush.bf16.msra.mxu1 %v1684_v1  ;;  %v1692_v13 = vld [vmem:[#allocation7 + $0x30] sm:$0xff]  ;;  %v1690_v15 = vld [vmem:[#allocation7 + $0x20] sm:$0xff]  ;;  %v1689_v16 = vld [vmem:[#allocation7 + $0x18] sm:$0xff]  ;;  %p2145_p1 = scmp.ne.s32.totalorder %s2143_s8, %s2144_s14  ;;  %p2149_p12 = scmp.lt.s32.totalorder %s2143_s8, %s2659_s7 }
  0x4b   : > { %1723 = vmatpush.bf16.msra.mxu2 %v1684_v1  ;;  %1724 = vmatpush.bf16.msra.mxu3 %v1684_v1  ;;  %v1671_v17 = vld [vmem:[%s2408_s19 + $0x8] sm:$0xff]  ;;  %v1673_v18 = vld [vmem:[%s2408_s19 + $0x18] sm:$0xff]  ;;  %v1688_v21 = vld [vmem:[#allocation7 + $0x10] sm:$0xff]  ;;  %p2150_p7 = scmp.lt.s32.totalorder %s2148_s1, %s2144_s14 }
  0x4c   : > { %v1675_v19 = vld [vmem:[%s2408_s19 + $0x28] sm:$0xff]  ;;  %v1677_v20 = vld [vmem:[%s2408_s19 + $0x38] sm:$0xff]  ;;  %v1686_v23 = vld [vmem:[#allocation7] sm:$0xff]  ;;  %p2146_p3 = pnand %p2145_p1, %p2370_p4 }
  0x4d   : > { %v1687_v22 = vld [vmem:[#allocation7 + $0x8] sm:$0xff]  ;;  %v2434_v24 = vld [vmem:[#allocation13] sm:$0xff]  ;;  %v1701_v62 = vld [vmem:[#allocation8 + $0x38] sm:$0xff]  ;;  %p2151_p8 = por %p2150_p7, %p2149_p12 }
  0x4e   : > { %530 = vmatpush.bf16.msra.mxu0 %v1683_v2  ;;  %1725 = vmatpush.bf16.msra.mxu1 %v1683_v2  ;;  %v2437_v26 = vperm.slane %v2434_v24, 0  ;;  %p2147_p5 = pneg %p2146_p3 }
  0x4f   : > { %1726 = vmatpush.bf16.msra.mxu2 %v1683_v2  ;;  %1727 = vmatpush.bf16.msra.mxu3 %v1683_v2 }
  0x50   : > { %p2152_p9 = pnand %p2151_p8, %p2147_p5 }
  0x52   : > { %531 = vmatpush.bf16.msra.mxu0 %v1682_v3  ;;  %1728 = vmatpush.bf16.msra.mxu1 %v1682_v3 }
  0x53   : > { %1729 = vmatpush.bf16.msra.mxu2 %v1682_v3  ;;  %1730 = vmatpush.bf16.msra.mxu3 %v1682_v3 }
  0x56   : > { %532 = vmatpush.bf16.msra.mxu0 %v1681_v4  ;;  %1731 = vmatpush.bf16.msra.mxu1 %v1681_v4 }
  0x57   : > { %1732 = vmatpush.bf16.msra.mxu2 %v1681_v4  ;;  %1733 = vmatpush.bf16.msra.mxu3 %v1681_v4 }
  0x5a   : > { %533 = vmatpush.bf16.msra.mxu0 %v1680_v5  ;;  %1734 = vmatpush.bf16.msra.mxu1 %v1680_v5 }
  0x5b   : > { %1735 = vmatpush.bf16.msra.mxu2 %v1680_v5  ;;  %1736 = vmatpush.bf16.msra.mxu3 %v1680_v5 }
  0x5e   : > { %534 = vmatpush.bf16.msra.mxu0 %v1679_v6  ;;  %1737 = vmatpush.bf16.msra.mxu1 %v1679_v6 }
  0x5f   : > { %1738 = vmatpush.bf16.msra.mxu2 %v1679_v6  ;;  %1739 = vmatpush.bf16.msra.mxu3 %v1679_v6 }
  0x62   : > { %535 = vmatpush.bf16.msra.mxu0 %v1678_v7  ;;  %1740 = vmatpush.bf16.msra.mxu1 %v1678_v7 }
  0x63   : > { %1741 = vmatpush.bf16.msra.mxu2 %v1678_v7  ;;  %1742 = vmatpush.bf16.msra.mxu3 %v1678_v7  ;;  %v1700_v7 = vld [vmem:[#allocation8 + $0x30] sm:$0xff] }
  0x65   : > { %536 = vmatmul.bf16.vlgmr.msra.gmra.mxu0 %v1670_v9  ;;  %546 = vmatmul.bf16.vlgmr.msra.gmra.mxu1 %v1672_v10  ;;  %v1698_v9 = vld [vmem:[#allocation8 + $0x20] sm:$0xff] }
  0x66   : > { %666 = vmatpush.bf16.msrb.mxu1 %v1693_v8  ;;  %556 = vmatmul.bf16.vlgmr.msra.gmra.mxu2 %v1674_v11  ;;  %v1699_v8 = vld [vmem:[#allocation8 + $0x28] sm:$0xff] }
  0x67   : > { %566 = vmatmul.bf16.vlgmr.msra.gmra.mxu3 %v1676_v12  ;;  %804 = vmatpush.bf16.msrb.mxu2 %v1701_v62 }
  0x6a   : > { %667 = vmatpush.bf16.msrb.mxu1 %v1692_v13  ;;  %v1697_v13 = vld [vmem:[#allocation8 + $0x18] sm:$0xff] }
  0x6b   : > { %805 = vmatpush.bf16.msrb.mxu2 %v1700_v7 }
  0x6e   : > { %668 = vmatpush.bf16.msrb.mxu1 %v1691_v14 }
  0x6f   : > { %806 = vmatpush.bf16.msrb.mxu2 %v1699_v8  ;;  %v1708_v8 = vld [vmem:[#allocation10 + $0x30] sm:$0xff] }
  0x72   : > { %669 = vmatpush.bf16.msrb.mxu1 %v1690_v15 }
  0x73   : > { %807 = vmatpush.bf16.msrb.mxu2 %v1698_v9  ;;  %v1707_v9 = vld [vmem:[#allocation10 + $0x28] sm:$0xff] }
  0x75   : > { %541 = vmatmul.bf16.gmra.mxu0 %v1671_v17  ;;  %551 = vmatmul.bf16.gmra.mxu1 %v1673_v18  ;;  %v1696_v17 = vld [vmem:[#allocation8 + $0x10] sm:$0xff]  ;;  %v1695_v18 = vld [vmem:[#allocation8 + $0x8] sm:$0xff] }
  0x76   : > { %670 = vmatpush.bf16.msrb.mxu1 %v1689_v16  ;;  %561 = vmatmul.bf16.gmra.mxu2 %v1675_v19 }
  0x77   : > { %571 = vmatmul.bf16.gmra.mxu3 %v1677_v20  ;;  %808 = vmatpush.bf16.msrb.mxu2 %v1697_v13  ;;  %v1706_v13 = vld [vmem:[#allocation10 + $0x20] sm:$0xff] }
  0x7a   : > { %671 = vmatpush.bf16.msrb.mxu1 %v1688_v21 }
  0x7b   : > { %809 = vmatpush.bf16.msrb.mxu2 %v1696_v17  ;;  %v1705_v17 = vld [vmem:[#allocation10 + $0x18] sm:$0xff] }
  0x7e   : > { %672 = vmatpush.bf16.msrb.mxu1 %v1687_v22  ;;  %v1694_v22 = vld [vmem:[#allocation8] sm:$0xff] }
  0x7f   : > { %810 = vmatpush.bf16.msrb.mxu2 %v1695_v18 }
  0x82   : > { %673 = vmatpush.bf16.msrb.mxu1 %v1686_v23 }
  0x83   : > { %811 = vmatpush.bf16.msrb.mxu2 %v1694_v22 }
  0xe2   : > { %v537_v25 = vpop.f32.mrf.mxu0  ;;  %v547_v34 = vpop.f32.mrf.mxu1 }
  0xe3   : > { %v538_v27 = vadd.f32 %v537_v25, %v2437_v26  ;;  %v548_v42 = vadd.f32 %v547_v34, %v2437_v26 }
  0xe5   : > { %v577_v30 = vmax.f32 %v538_v27, 0.0  ;;  %v581_v45 = vmax.f32 %v548_v42, 0.0 }
  0xe9   : > { %v557_v49 = vpop.f32.mrf.mxu2 }
  0xea   : > { %v539_v28 = vpop.f32.mrf.mxu0  ;;  %v549_v41 = vpop.f32.mrf.mxu1  ;;  %v558_v56 = vadd.f32 %v557_v49, %v2437_v26 }
  0xeb   : > { %v540_v29 = vadd.f32 %v539_v28, %v2437_v26  ;;  %v550_v43 = vadd.f32 %v549_v41, %v2437_v26  ;;  %v567_v0 = vpop.f32.mrf.mxu3 }
  0xec   : > { %v585_v59 = vmax.f32 %v558_v56, 0.0  ;;  %v568_v10 = vadd.f32 %v567_v0, %v2437_v26 }
  0xed   : > { %v578_v31 = vmax.f32 %v540_v29, 0.0  ;;  %v582_v46 = vmax.f32 %v550_v43, 0.0  ;;  %v2456_v29 = vperm.slane %v2434_v24, 1 }
  0xee   : > { %v589_v14 = vmax.f32 %v568_v10, 0.0 }
  0xef   : > { %v593_v32 = vpack.c.bf16 %v578_v31, %v577_v30  ;;  %v595_v47 = vpack.c.bf16 %v582_v46, %v581_v45 }
  0xf1   : > { %674 = vmatmul.bf16.vlgmr.msrb.gmra.mxu1 %v593_v32  ;;  %v559_v55 = vpop.f32.mrf.mxu2 }
  0xf2   : > { %v542_v33 = vpop.f32.mrf.mxu0  ;;  %v552_v44 = vpop.f32.mrf.mxu1  ;;  %v560_v57 = vadd.f32 %v559_v55, %v2437_v26 }
  0xf3   : > { %v543_v35 = vadd.f32 %v542_v33, %v2437_v26  ;;  %v553_v50 = vadd.f32 %v552_v44, %v2437_v26  ;;  %v569_v6 = vpop.f32.mrf.mxu3 }
  0xf4   : > { %v586_v60 = vmax.f32 %v560_v57, 0.0  ;;  %v570_v11 = vadd.f32 %v569_v6, %v2437_v26  ;;  %v1709_v6 = vld [vmem:[#allocation10 + $0x38] sm:$0xff] }
  0xf5   : > { %v579_v38 = vmax.f32 %v543_v35, 0.0  ;;  %v583_v52 = vmax.f32 %v553_v50, 0.0  ;;  %942 = vmatpush.bf16.msrb.mxu3 %v1709_v6 }
  0xf6   : > { %v597_v61 = vpack.c.bf16 %v586_v60, %v585_v59  ;;  %v590_v15 = vmax.f32 %v570_v11, 0.0 }
  0xf8   : > { %v599_v16 = vpack.c.bf16 %v590_v15, %v589_v14 }
  0xf9   : > { %v562_v58 = vpop.f32.mrf.mxu2  ;;  %943 = vmatpush.bf16.msrb.mxu3 %v1708_v8  ;;  %v1717_v8 = vld [vmem:[#allocation11 + $0x38] sm:$0xff] }
  0xfa   : > { %v544_v36 = vpop.f32.mrf.mxu0  ;;  %v554_v48 = vpop.f32.mrf.mxu1  ;;  %v563_v1 = vadd.f32 %v562_v58, %v2437_v26  ;;  %1080 = vmatpush.bf16.msrb.mxu0 %v1717_v8 }
  0xfb   : > { %v545_v37 = vadd.f32 %v544_v36, %v2437_v26  ;;  %v555_v51 = vadd.f32 %v554_v48, %v2437_v26  ;;  %v572_v12 = vpop.f32.mrf.mxu3 }
  0xfc   : > { %v587_v3 = vmax.f32 %v563_v1, 0.0  ;;  %v573_v20 = vadd.f32 %v572_v12, %v2437_v26 }
  0xfd   : > { %v580_v39 = vmax.f32 %v545_v37, 0.0  ;;  %v584_v53 = vmax.f32 %v555_v51, 0.0  ;;  %944 = vmatpush.bf16.msrb.mxu3 %v1707_v9 }
  0xfe   : > { %v591_v23 = vmax.f32 %v573_v20, 0.0  ;;  %v1703_v20 = vld [vmem:[#allocation10 + $0x8] sm:$0xff] }
  0xff   : > { %v594_v40 = vpack.c.bf16 %v580_v39, %v579_v38  ;;  %v596_v54 = vpack.c.bf16 %v584_v53, %v583_v52 }
 0x101   : > { %679 = vmatmul.bf16.gmra.mxu1 %v594_v40  ;;  %v564_v63 = vpop.f32.mrf.mxu2  ;;  %945 = vmatpush.bf16.msrb.mxu3 %v1706_v13 }
 0x102   : > { %v565_v2 = vadd.f32 %v564_v63, %v2437_v26 }
 0x103   : > { %v574_v19 = vpop.f32.mrf.mxu3 }
 0x104   : > { %v588_v4 = vmax.f32 %v565_v2, 0.0  ;;  %v575_v21 = vadd.f32 %v574_v19, %v2437_v26  ;;  %v1704_v19 = vld [vmem:[#allocation10 + $0x10] sm:$0xff] }
 0x105   : > { %946 = vmatpush.bf16.msrb.mxu3 %v1705_v17 }
 0x106   : > { %v598_v5 = vpack.c.bf16 %v588_v4, %v587_v3  ;;  %v592_v25 = vmax.f32 %v575_v21, 0.0 }
 0x108   : > { %v600_v27 = vpack.c.bf16 %v592_v25, %v591_v23 }
 0x109   : > { %947 = vmatpush.bf16.msrb.mxu3 %v1704_v19  ;;  %v1713_v19 = vld [vmem:[#allocation11 + $0x18] sm:$0xff] }
 0x10d   : > { %948 = vmatpush.bf16.msrb.mxu3 %v1703_v20 }
 0x111   : > { %684 = vmatmul.bf16.gmra.mxu1 %v595_v47 }
 0x121   : > { %689 = vmatmul.bf16.gmra.mxu1 %v596_v54 }
 0x131   : > { %694 = vmatmul.bf16.gmra.mxu1 %v597_v61 }
 0x141   : > { %699 = vmatmul.bf16.gmra.mxu1 %v598_v5 }
 0x151   : > { %704 = vmatmul.bf16.gmra.mxu1 %v599_v16 }
 0x161   : > { %709 = vmatmul.bf16.gmra.mxu1 %v600_v27 }
 0x16e   : > { %v675_v28 = vpop.f32.mrf.mxu1 }
 0x16f   : > { %v676_v30 = vadd.f32 %v675_v28, %v2456_v29  ;;  %v1702_v28 = vld [vmem:[#allocation10] sm:$0xff] }
 0x170   : > { %949 = vmatpush.bf16.msrb.mxu3 %v1702_v28 }
 0x171   : > { %v715_v33 = vmax.f32 %v676_v30, 0.0 }
 0x176   : > { %v677_v31 = vpop.f32.mrf.mxu1 }
 0x177   : > { %v678_v32 = vadd.f32 %v677_v31, %v2456_v29 }
 0x179   : > { %v716_v34 = vmax.f32 %v678_v32, 0.0  ;;  %v2475_v32 = vperm.slane %v2434_v24, 2 }
 0x17b   : > { %v731_v35 = vpack.c.bf16 %v716_v34, %v715_v33 }
 0x17d   : > { %812 = vmatmul.bf16.vlgmr.msrb.gmra.mxu2 %v731_v35 }
 0x17e   : > { %v680_v26 = vpop.f32.mrf.mxu1 }
 0x17f   : > { %v681_v36 = vadd.f32 %v680_v26, %v2456_v29 }
 0x181   : > { %v717_v39 = vmax.f32 %v681_v36, 0.0 }
 0x186   : > { %v682_v37 = vpop.f32.mrf.mxu1 }
 0x187   : > { %v683_v38 = vadd.f32 %v682_v37, %v2456_v29 }
 0x189   : > { %v718_v40 = vmax.f32 %v683_v38, 0.0 }
 0x18b   : > { %v732_v41 = vpack.c.bf16 %v718_v40, %v717_v39 }
 0x18d   : > { %817 = vmatmul.bf16.gmra.mxu2 %v732_v41 }
 0x18e   : > { %v685_v42 = vpop.f32.mrf.mxu1 }
 0x18f   : > { %v686_v43 = vadd.f32 %v685_v42, %v2456_v29 }
 0x191   : > { %v719_v46 = vmax.f32 %v686_v43, 0.0 }
 0x196   : > { %v687_v44 = vpop.f32.mrf.mxu1 }
 0x197   : > { %v688_v45 = vadd.f32 %v687_v44, %v2456_v29 }
 0x199   : > { %v720_v47 = vmax.f32 %v688_v45, 0.0 }
 0x19b   : > { %v733_v48 = vpack.c.bf16 %v720_v47, %v719_v46 }
 0x19d   : > { %822 = vmatmul.bf16.gmra.mxu2 %v733_v48 }
 0x19e   : > { %v690_v49 = vpop.f32.mrf.mxu1 }
 0x19f   : > { %v691_v50 = vadd.f32 %v690_v49, %v2456_v29 }
 0x1a1   : > { %v721_v53 = vmax.f32 %v691_v50, 0.0 }
 0x1a6   : > { %v692_v51 = vpop.f32.mrf.mxu1 }
 0x1a7   : > { %v693_v52 = vadd.f32 %v692_v51, %v2456_v29 }
 0x1a9   : > { %v722_v54 = vmax.f32 %v693_v52, 0.0 }
 0x1ab   : > { %v734_v55 = vpack.c.bf16 %v722_v54, %v721_v53 }
 0x1ad   : > { %827 = vmatmul.bf16.gmra.mxu2 %v734_v55 }
 0x1ae   : > { %v695_v56 = vpop.f32.mrf.mxu1 }
 0x1af   : > { %v696_v57 = vadd.f32 %v695_v56, %v2456_v29 }
 0x1b1   : > { %v723_v60 = vmax.f32 %v696_v57, 0.0 }
 0x1b6   : > { %v697_v58 = vpop.f32.mrf.mxu1 }
 0x1b7   : > { %v698_v59 = vadd.f32 %v697_v58, %v2456_v29 }
 0x1b9   : > { %v724_v61 = vmax.f32 %v698_v59, 0.0 }
 0x1bb   : > { %v735_v62 = vpack.c.bf16 %v724_v61, %v723_v60 }
 0x1bd   : > { %832 = vmatmul.bf16.gmra.mxu2 %v735_v62 }
 0x1be   : > { %v700_v63 = vpop.f32.mrf.mxu1 }
 0x1bf   : > { %v701_v0 = vadd.f32 %v700_v63, %v2456_v29 }
 0x1c1   : > { %v725_v3 = vmax.f32 %v701_v0, 0.0 }
 0x1c6   : > { %v702_v1 = vpop.f32.mrf.mxu1 }
 0x1c7   : > { %v703_v2 = vadd.f32 %v702_v1, %v2456_v29 }
 0x1c9   : > { %v726_v4 = vmax.f32 %v703_v2, 0.0 }
 0x1cb   : > { %v736_v5 = vpack.c.bf16 %v726_v4, %v725_v3 }
 0x1cd   : > { %837 = vmatmul.bf16.gmra.mxu2 %v736_v5 }
 0x1ce   : > { %v705_v7 = vpop.f32.mrf.mxu1 }
 0x1cf   : > { %v706_v10 = vadd.f32 %v705_v7, %v2456_v29 }
 0x1d1   : > { %v727_v14 = vmax.f32 %v706_v10, 0.0  ;;  %v1716_v10 = vld [vmem:[#allocation11 + $0x30] sm:$0xff] }
 0x1d2   : > { %1081 = vmatpush.bf16.msrb.mxu0 %v1716_v10 }
 0x1d6   : > { %v707_v11 = vpop.f32.mrf.mxu1 }
 0x1d7   : > { %v708_v12 = vadd.f32 %v707_v11, %v2456_v29  ;;  %v1715_v11 = vld [vmem:[#allocation11 + $0x28] sm:$0xff] }
 0x1d8   : > { %1082 = vmatpush.bf16.msrb.mxu0 %v1715_v11 }
 0x1d9   : > { %v728_v15 = vmax.f32 %v708_v12, 0.0 }
 0x1db   : > { %v737_v16 = vpack.c.bf16 %v728_v15, %v727_v14  ;;  %v1714_v15 = vld [vmem:[#allocation11 + $0x20] sm:$0xff] }
 0x1dc   : > { %1083 = vmatpush.bf16.msrb.mxu0 %v1714_v15 }
 0x1dd   : > { %842 = vmatmul.bf16.gmra.mxu2 %v737_v16 }
 0x1de   : > { %v710_v18 = vpop.f32.mrf.mxu1 }
 0x1df   : > { %v711_v21 = vadd.f32 %v710_v18, %v2456_v29 }
 0x1e0   : > { %1084 = vmatpush.bf16.msrb.mxu0 %v1713_v19 }
 0x1e1   : > { %v729_v25 = vmax.f32 %v711_v21, 0.0  ;;  %v1712_v21 = vld [vmem:[#allocation11 + $0x10] sm:$0xff] }
 0x1e4   : > { %1085 = vmatpush.bf16.msrb.mxu0 %v1712_v21 }
 0x1e6   : > { %v712_v22 = vpop.f32.mrf.mxu1 }
 0x1e7   : > { %v713_v23 = vadd.f32 %v712_v22, %v2456_v29  ;;  %v1711_v22 = vld [vmem:[#allocation11 + $0x8] sm:$0xff] }
 0x1e8   : > { %1086 = vmatpush.bf16.msrb.mxu0 %v1711_v22 }
 0x1e9   : > { %v730_v27 = vmax.f32 %v713_v23, 0.0 }
 0x1eb   : > { %v738_v30 = vpack.c.bf16 %v730_v27, %v729_v25 }
 0x1ed   : > { %847 = vmatmul.bf16.gmra.mxu2 %v738_v30 }
 0x200   : > { %v813_v31 = vpop.f32.mrf.mxu2 }
 0x201   : > { %v814_v33 = vadd.f32 %v813_v31, %v2475_v32  ;;  %v1710_v31 = vld [vmem:[#allocation11] sm:$0xff] }
 0x202   : > { %1087 = vmatpush.bf16.msrb.mxu0 %v1710_v31 }
 0x203   : > { %v853_v26 = vmax.f32 %v814_v33, 0.0 }
 0x208   : > { %v815_v34 = vpop.f32.mrf.mxu2 }
 0x209   : > { %v816_v35 = vadd.f32 %v815_v34, %v2475_v32 }
 0x20b   : > { %v854_v36 = vmax.f32 %v816_v35, 0.0  ;;  %v893_v35 = vperm.slane %v2434_v24, 3 }
 0x20d   : > { %v869_v37 = vpack.c.bf16 %v854_v36, %v853_v26 }
 0x20f   : > { %950 = vmatmul.bf16.vlgmr.msrb.gmra.mxu3 %v869_v37 }
 0x210   : > { %v818_v29 = vpop.f32.mrf.mxu2 }
 0x211   : > { %v819_v38 = vadd.f32 %v818_v29, %v2475_v32 }
 0x213   : > { %v855_v41 = vmax.f32 %v819_v38, 0.0 }
 0x218   : > { %v820_v39 = vpop.f32.mrf.mxu2 }
 0x219   : > { %v821_v40 = vadd.f32 %v820_v39, %v2475_v32 }
 0x21b   : > { %v856_v42 = vmax.f32 %v821_v40, 0.0 }
 0x21d   : > { %v870_v43 = vpack.c.bf16 %v856_v42, %v855_v41 }
 0x21f   : > { %955 = vmatmul.bf16.gmra.mxu3 %v870_v43 }
 0x220   : > { %v823_v44 = vpop.f32.mrf.mxu2 }
 0x221   : > { %v824_v45 = vadd.f32 %v823_v44, %v2475_v32 }
 0x223   : > { %v857_v48 = vmax.f32 %v824_v45, 0.0 }
 0x228   : > { %v825_v46 = vpop.f32.mrf.mxu2 }
 0x229   : > { %v826_v47 = vadd.f32 %v825_v46, %v2475_v32 }
 0x22b   : > { %v858_v49 = vmax.f32 %v826_v47, 0.0 }
 0x22d   : > { %v871_v50 = vpack.c.bf16 %v858_v49, %v857_v48 }
 0x22f   : > { %960 = vmatmul.bf16.gmra.mxu3 %v871_v50 }
 0x230   : > { %v828_v51 = vpop.f32.mrf.mxu2 }
 0x231   : > { %v829_v52 = vadd.f32 %v828_v51, %v2475_v32 }
 0x233   : > { %v859_v55 = vmax.f32 %v829_v52, 0.0 }
 0x238   : > { %v830_v53 = vpop.f32.mrf.mxu2 }
 0x239   : > { %v831_v54 = vadd.f32 %v830_v53, %v2475_v32 }
 0x23b   : > { %v860_v56 = vmax.f32 %v831_v54, 0.0 }
 0x23d   : > { %v872_v57 = vpack.c.bf16 %v860_v56, %v859_v55 }
 0x23f   : > { %965 = vmatmul.bf16.gmra.mxu3 %v872_v57 }
 0x240   : > { %v833_v58 = vpop.f32.mrf.mxu2 }
 0x241   : > { %v834_v59 = vadd.f32 %v833_v58, %v2475_v32 }
 0x243   : > { %v861_v62 = vmax.f32 %v834_v59, 0.0 }
 0x248   : > { %v835_v60 = vpop.f32.mrf.mxu2 }
 0x249   : > { %v836_v61 = vadd.f32 %v835_v60, %v2475_v32 }
 0x24b   : > { %v862_v63 = vmax.f32 %v836_v61, 0.0 }
 0x24d   : > { %v873_v0 = vpack.c.bf16 %v862_v63, %v861_v62 }
 0x24f   : > { %970 = vmatmul.bf16.gmra.mxu3 %v873_v0 }
 0x250   : > { %v838_v1 = vpop.f32.mrf.mxu2 }
 0x251   : > { %v839_v2 = vadd.f32 %v838_v1, %v2475_v32 }
 0x253   : > { %v863_v5 = vmax.f32 %v839_v2, 0.0 }
 0x258   : > { %v840_v3 = vpop.f32.mrf.mxu2 }
 0x259   : > { %v841_v4 = vadd.f32 %v840_v3, %v2475_v32 }
 0x25b   : > { %v864_v6 = vmax.f32 %v841_v4, 0.0 }
 0x25d   : > { %v874_v7 = vpack.c.bf16 %v864_v6, %v863_v5 }
 0x25f   : > { %975 = vmatmul.bf16.gmra.mxu3 %v874_v7 }
 0x260   : > { %v843_v9 = vpop.f32.mrf.mxu2 }
 0x261   : > { %v844_v12 = vadd.f32 %v843_v9, %v2475_v32 }
 0x263   : > { %v865_v16 = vmax.f32 %v844_v12, 0.0 }
 0x268   : > { %v845_v13 = vpop.f32.mrf.mxu2 }
 0x269   : > { %v846_v14 = vadd.f32 %v845_v13, %v2475_v32 }
 0x26b   : > { %v866_v17 = vmax.f32 %v846_v14, 0.0 }
 0x26d   : > { %v875_v18 = vpack.c.bf16 %v866_v17, %v865_v16 }
 0x26f   : > { %980 = vmatmul.bf16.gmra.mxu3 %v875_v18 }
 0x270   : > { %v848_v20 = vpop.f32.mrf.mxu2 }
 0x271   : > { %v849_v23 = vadd.f32 %v848_v20, %v2475_v32 }
 0x273   : > { %v867_v28 = vmax.f32 %v849_v23, 0.0 }
 0x278   : > { %v850_v25 = vpop.f32.mrf.mxu2 }
 0x279   : > { %v851_v27 = vadd.f32 %v850_v25, %v2475_v32  ;;  %v1031_v25 = vperm.slane %v2434_v24, 4 }
 0x27b   : > { %v868_v30 = vmax.f32 %v851_v27, 0.0 }
 0x27d   : > { %v876_v33 = vpack.c.bf16 %v868_v30, %v867_v28 }
 0x27f   : > { %985 = vmatmul.bf16.gmra.mxu3 %v876_v33 }
 0x292   : > { %v951_v34 = vpop.f32.mrf.mxu3 }
 0x293   : > { %v952_v26 = vadd.f32 %v951_v34, %v893_v35 }
 0x295   : > { %v991_v29 = vmax.f32 %v952_v26, 0.0 }
 0x29a   : > { %v953_v36 = vpop.f32.mrf.mxu3 }
 0x29b   : > { %v954_v37 = vadd.f32 %v953_v36, %v893_v35 }
 0x29d   : > { %v992_v38 = vmax.f32 %v954_v37, 0.0 }
 0x29f   : > { %v1007_v39 = vpack.c.bf16 %v992_v38, %v991_v29 }
 0x2a1   : > { %1088 = vmatmul.bf16.vlgmr.msrb.gmra.mxu0 %v1007_v39 }
 0x2a2   : > { %v956_v40 = vpop.f32.mrf.mxu3 }
 0x2a3   : > { %v957_v41 = vadd.f32 %v956_v40, %v893_v35 }
 0x2a5   : > { %v993_v43 = vmax.f32 %v957_v41, 0.0 }
 0x2aa   : > { %v958_v32 = vpop.f32.mrf.mxu3 }
 0x2ab   : > { %v959_v42 = vadd.f32 %v958_v32, %v893_v35 }
 0x2ad   : > { %v994_v44 = vmax.f32 %v959_v42, 0.0 }
 0x2af   : > { %v1008_v45 = vpack.c.bf16 %v994_v44, %v993_v43 }
 0x2b1   : > { %1093 = vmatmul.bf16.gmra.mxu0 %v1008_v45 }
 0x2b2   : > { %v961_v46 = vpop.f32.mrf.mxu3 }
 0x2b3   : > { %v962_v47 = vadd.f32 %v961_v46, %v893_v35 }
 0x2b5   : > { %v995_v50 = vmax.f32 %v962_v47, 0.0 }
 0x2ba   : > { %v963_v48 = vpop.f32.mrf.mxu3 }
 0x2bb   : > { %v964_v49 = vadd.f32 %v963_v48, %v893_v35 }
 0x2bd   : > { %v996_v51 = vmax.f32 %v964_v49, 0.0 }
 0x2bf   : > { %v1009_v52 = vpack.c.bf16 %v996_v51, %v995_v50 }
 0x2c1   : > { %1098 = vmatmul.bf16.gmra.mxu0 %v1009_v52 }
 0x2c2   : > { %v966_v53 = vpop.f32.mrf.mxu3 }
 0x2c3   : > { %v967_v54 = vadd.f32 %v966_v53, %v893_v35 }
 0x2c5   : > { %v997_v57 = vmax.f32 %v967_v54, 0.0 }
 0x2ca   : > { %v968_v55 = vpop.f32.mrf.mxu3 }
 0x2cb   : > { %v969_v56 = vadd.f32 %v968_v55, %v893_v35 }
 0x2cd   : > { %v998_v58 = vmax.f32 %v969_v56, 0.0 }
 0x2cf   : > { %v1010_v59 = vpack.c.bf16 %v998_v58, %v997_v57 }
 0x2d1   : > { %1103 = vmatmul.bf16.gmra.mxu0 %v1010_v59 }
 0x2d2   : > { %v971_v60 = vpop.f32.mrf.mxu3 }
 0x2d3   : > { %v972_v61 = vadd.f32 %v971_v60, %v893_v35 }
 0x2d5   : > { %v999_v0 = vmax.f32 %v972_v61, 0.0 }
 0x2da   : > { %v973_v62 = vpop.f32.mrf.mxu3 }
 0x2db   : > { %v974_v63 = vadd.f32 %v973_v62, %v893_v35 }
 0x2dd   : > { %v1000_v1 = vmax.f32 %v974_v63, 0.0 }
 0x2df   : > { %v1011_v2 = vpack.c.bf16 %v1000_v1, %v999_v0 }
 0x2e1   : > { %1108 = vmatmul.bf16.gmra.mxu0 %v1011_v2 }
 0x2e2   : > { %v976_v3 = vpop.f32.mrf.mxu3 }
 0x2e3   : > { %v977_v4 = vadd.f32 %v976_v3, %v893_v35 }
 0x2e5   : > { %v1001_v7 = vmax.f32 %v977_v4, 0.0 }
 0x2ea   : > { %v978_v5 = vpop.f32.mrf.mxu3 }
 0x2eb   : > { %v979_v6 = vadd.f32 %v978_v5, %v893_v35 }
 0x2ed   : > { %v1002_v8 = vmax.f32 %v979_v6, 0.0 }
 0x2ef   : > { %v1012_v9 = vpack.c.bf16 %v1002_v8, %v1001_v7 }
 0x2f1   : > { %1113 = vmatmul.bf16.gmra.mxu0 %v1012_v9 }
 0x2f2   : > { %v981_v10 = vpop.f32.mrf.mxu3 }
 0x2f3   : > { %v982_v11 = vadd.f32 %v981_v10, %v893_v35 }
 0x2f5   : > { %v1003_v14 = vmax.f32 %v982_v11, 0.0 }
 0x2fa   : > { %v983_v12 = vpop.f32.mrf.mxu3 }
 0x2fb   : > { %v984_v13 = vadd.f32 %v983_v12, %v893_v35 }
 0x2fd   : > { %v1004_v15 = vmax.f32 %v984_v13, 0.0 }
 0x2ff   : > { %v1013_v16 = vpack.c.bf16 %v1004_v15, %v1003_v14 }
 0x301   : > { %1118 = vmatmul.bf16.gmra.mxu0 %v1013_v16 }
 0x302   : > { %v986_v17 = vpop.f32.mrf.mxu3 }
 0x303   : > { %v987_v18 = vadd.f32 %v986_v17, %v893_v35 }
 0x305   : > { %v1005_v21 = vmax.f32 %v987_v18, 0.0 }
 0x30a   : > { %v988_v19 = vpop.f32.mrf.mxu3 }
 0x30b   : > { %v989_v20 = vadd.f32 %v988_v19, %v893_v35 }
 0x30d   : > { %v1006_v22 = vmax.f32 %v989_v20, 0.0 }
 0x30f   : > { %v1014_v23 = vpack.c.bf16 %v1006_v22, %v1005_v21 }
 0x311   : > { %1123 = vmatmul.bf16.gmra.mxu0 %v1014_v23 }
 0x31e   : > { %v1089_v27 = vpop.f32.mrf.mxu0 }
 0x31f   : > { %v1090_v28 = vadd.f32 %v1089_v27, %v1031_v25 }
 0x321   : > { %1129 = vmax.xlane.f32.xlu0 %v1090_v28 }
 0x326   : > { %v1091_v30 = vpop.f32.mrf.mxu0 }
 0x327   : > { %v1092_v31 = vadd.f32 %v1091_v30, %v1031_v25 }
 0x329   : > { %1131 = vmax.xlane.f32.xlu0 %v1092_v31 }
 0x32e   : > { %v1094_v33 = vpop.f32.mrf.mxu0 }
 0x32f   : > { %v1095_v34 = vadd.f32 %v1094_v33, %v1031_v25 }
 0x331   : > { %1133 = vmax.xlane.f32.xlu1 %v1095_v34 }
 0x336   : > { %v1096_v26 = vpop.f32.mrf.mxu0 }
 0x337   : > { %v1097_v36 = vadd.f32 %v1096_v26, %v1031_v25 }
 0x339   : > { %1135 = vmax.xlane.f32.xlu1 %v1097_v36 }
 0x33e   : > { %v1099_v37 = vpop.f32.mrf.mxu0 }
 0x33f   : > { %v1100_v35 = vadd.f32 %v1099_v37, %v1031_v25 }
 0x341   : > { %1137 = vmax.xlane.f32.xlu2 %v1100_v35 }
 0x346   : > { %v1101_v29 = vpop.f32.mrf.mxu0 }
 0x347   : > { %v1102_v38 = vadd.f32 %v1101_v29, %v1031_v25 }
 0x349   : > { %1139 = vmax.xlane.f32.xlu2 %v1102_v38 }
 0x34e   : > { %v1104_v39 = vpop.f32.mrf.mxu0 }
 0x34f   : > { %v2495_v24 = vadd.f32 %v1104_v39, %v1031_v25 }
 0x351   : > { %1141 = vmax.xlane.f32.xlu0 %v2495_v24 }
 0x356   : > { %v1106_v40 = vpop.f32.mrf.mxu0 }
 0x357   : > { %v2498_v41 = vadd.f32 %v1106_v40, %v1031_v25 }
 0x359   : > { %1143 = vmax.xlane.f32.xlu1 %v2498_v41 }
 0x35e   : > { %v1109_v32 = vpop.f32.mrf.mxu0 }
 0x35f   : > { %v2501_v42 = vadd.f32 %v1109_v32, %v1031_v25 }
 0x361   : > { %1145 = vmax.xlane.f32.xlu2 %v2501_v42 }
 0x366   : > { %v1111_v43 = vpop.f32.mrf.mxu0 }
 0x367   : > { %v2504_v44 = vadd.f32 %v1111_v43, %v1031_v25 }
 0x369   : > { %1147 = vmax.xlane.f32.xlu0 %v2504_v44 }
 0x36e   : > { %v1114_v45 = vpop.f32.mrf.mxu0 }
 0x36f   : > { %v2507_v46 = vadd.f32 %v1114_v45, %v1031_v25 }
 0x371   : > { %1149 = vmax.xlane.f32.xlu1 %v2507_v46 }
 0x376   : > { %v1116_v47 = vpop.f32.mrf.mxu0 }
 0x377   : > { %v2510_v48 = vadd.f32 %v1116_v47, %v1031_v25 }
 0x379   : > { %1151 = vmax.xlane.f32.xlu2 %v2510_v48 }
 0x37e   : > { %v1119_v49 = vpop.f32.mrf.mxu0 }
 0x37f   : > { %v2513_v50 = vadd.f32 %v1119_v49, %v1031_v25 }
 0x381   : > { %1153 = vmax.xlane.f32.xlu0 %v2513_v50 }
 0x386   : > { %v1121_v51 = vpop.f32.mrf.mxu0 }
 0x387   : > { %v2516_v52 = vadd.f32 %v1121_v51, %v1031_v25 }
 0x389   : > { %1155 = vmax.xlane.f32.xlu1 %v2516_v52 }
 0x38e   : > { %v1124_v53 = vpop.f32.mrf.mxu0 }
 0x38f   : > { %v2519_v54 = vadd.f32 %v1124_v53, %v1031_v25 }
 0x391   : > { %1157 = vmax.xlane.f32.xlu2 %v2519_v54 }
 0x394   : > { %v1130_v55 = vpop.xlane.xlu0 %1129 }
 0x395   : > { %v2522_v56 = vsub.f32 %v1090_v28, %v1130_v55 }
 0x396   : > { %v1126_v57 = vpop.f32.mrf.mxu0 }
 0x397   : > { %v1177_v58 = vmul.f32 1.442695, %v2522_v56  ;;  %v2525_v59 = vadd.f32 %v1126_v57, %v1031_v25 }
 0x399   : > { %1854 = vpow2.f32 %v1177_v58  ;;  %1159 = vmax.xlane.f32.xlu0 %v2525_v59 }
 0x39c   : > { %v1132_v60 = vpop.xlane.xlu0 %1131 }
 0x39d   : > { %v2528_v61 = vsub.f32 %v1092_v31, %v1132_v60 }
 0x39f   : > { %v1855_v62 = vpop.eup %1854  ;;  %v1179_v63 = vmul.f32 1.442695, %v2528_v61 }
 0x3a0   : > { %1209 = vadd.xlane.f32.xlu1 %v1855_v62 }
 0x3a1   : > { %1856 = vpow2.f32 %v1179_v63 }
 0x3a4   : > { %v1134_v0 = vpop.xlane.xlu1 %1133 }
 0x3a5   : > { %v2531_v1 = vsub.f32 %v1095_v34, %v1134_v0 }
 0x3a7   : > { %v1857_v2 = vpop.eup %1856  ;;  %v1181_v3 = vmul.f32 1.442695, %v2531_v1 }
 0x3a8   : > { %1211 = vadd.xlane.f32.xlu2 %v1857_v2 }
 0x3a9   : > { %1858 = vpow2.f32 %v1181_v3 }
 0x3ac   : > { %v1136_v4 = vpop.xlane.xlu1 %1135 }
 0x3ad   : > { %v2534_v5 = vsub.f32 %v1097_v36, %v1136_v4 }
 0x3af   : > { %v1859_v6 = vpop.eup %1858  ;;  %v1183_v7 = vmul.f32 1.442695, %v2534_v5 }
 0x3b0   : > { %1213 = vadd.xlane.f32.xlu0 %v1859_v6 }
 0x3b1   : > { %1860 = vpow2.f32 %v1183_v7 }
 0x3b4   : > { %v1138_v8 = vpop.xlane.xlu2 %1137 }
 0x3b5   : > { %v2537_v9 = vsub.f32 %v1100_v35, %v1138_v8 }
 0x3b7   : > { %v1861_v10 = vpop.eup %1860  ;;  %v1185_v11 = vmul.f32 1.442695, %v2537_v9 }
 0x3b8   : > { %1215 = vadd.xlane.f32.xlu1 %v1861_v10 }
 0x3b9   : > { %1862 = vpow2.f32 %v1185_v11 }
 0x3bc   : > { %v1140_v12 = vpop.xlane.xlu2 %1139 }
 0x3bd   : > { %v2540_v13 = vsub.f32 %v1102_v38, %v1140_v12 }
 0x3bf   : > { %v1863_v14 = vpop.eup %1862  ;;  %v1187_v15 = vmul.f32 1.442695, %v2540_v13 }
 0x3c0   : > { %1217 = vadd.xlane.f32.xlu2 %v1863_v14 }
 0x3c1   : > { %1864 = vpow2.f32 %v1187_v15 }
 0x3c4   : > { %v1142_v16 = vpop.xlane.xlu0 %1141 }
 0x3c5   : > { %v2544_v17 = vsub.f32 %v2495_v24, %v1142_v16 }
 0x3c7   : > { %v1865_v18 = vpop.eup %1864  ;;  %v1189_v19 = vmul.f32 1.442695, %v2544_v17 }
 0x3c8   : > { %1219 = vadd.xlane.f32.xlu0 %v1865_v18 }
 0x3c9   : > { %1866 = vpow2.f32 %v1189_v19 }
 0x3cc   : > { %v1144_v20 = vpop.xlane.xlu1 %1143 }
 0x3cd   : > { %v2548_v21 = vsub.f32 %v2498_v41, %v1144_v20 }
 0x3cf   : > { %v1867_v22 = vpop.eup %1866  ;;  %v1191_v23 = vmul.f32 1.442695, %v2548_v21 }
 0x3d0   : > { %1221 = vadd.xlane.f32.xlu1 %v1867_v22 }
 0x3d1   : > { %1868 = vpow2.f32 %v1191_v23 }
 0x3d4   : > { %v1146_v25 = vpop.xlane.xlu2 %1145 }
 0x3d5   : > { %v2552_v27 = vsub.f32 %v2501_v42, %v1146_v25 }
 0x3d7   : > { %v1869_v28 = vpop.eup %1868  ;;  %v1193_v30 = vmul.f32 1.442695, %v2552_v27 }
 0x3d8   : > { %1223 = vadd.xlane.f32.xlu2 %v1869_v28 }
 0x3d9   : > { %1870 = vpow2.f32 %v1193_v30 }
 0x3dc   : > { %v1148_v31 = vpop.xlane.xlu0 %1147 }
 0x3dd   : > { %v2556_v33 = vsub.f32 %v2504_v44, %v1148_v31 }
 0x3df   : > { %v1871_v34 = vpop.eup %1870  ;;  %v1195_v26 = vmul.f32 1.442695, %v2556_v33 }
 0x3e0   : > { %1225 = vadd.xlane.f32.xlu0 %v1871_v34 }
 0x3e1   : > { %1872 = vpow2.f32 %v1195_v26 }
 0x3e4   : > { %v1150_v36 = vpop.xlane.xlu1 %1149 }
 0x3e5   : > { %v2560_v37 = vsub.f32 %v2507_v46, %v1150_v36 }
 0x3e7   : > { %v1873_v35 = vpop.eup %1872  ;;  %v1197_v29 = vmul.f32 1.442695, %v2560_v37 }
 0x3e8   : > { %1227 = vadd.xlane.f32.xlu1 %v1873_v35 }
 0x3e9   : > { %1874 = vpow2.f32 %v1197_v29 }
 0x3ec   : > { %v1152_v38 = vpop.xlane.xlu2 %1151 }
 0x3ed   : > { %v2564_v39 = vsub.f32 %v2510_v48, %v1152_v38 }
 0x3ef   : > { %v1875_v24 = vpop.eup %1874  ;;  %v1199_v40 = vmul.f32 1.442695, %v2564_v39 }
 0x3f0   : > { %1229 = vadd.xlane.f32.xlu2 %v1875_v24 }
 0x3f1   : > { %1876 = vpow2.f32 %v1199_v40 }
 0x3f4   : > { %v1154_v41 = vpop.xlane.xlu0 %1153 }
 0x3f5   : > { %v2568_v32 = vsub.f32 %v2513_v50, %v1154_v41 }
 0x3f7   : > { %v1877_v42 = vpop.eup %1876  ;;  %v1201_v43 = vmul.f32 1.442695, %v2568_v32 }
 0x3f8   : > { %1231 = vadd.xlane.f32.xlu0 %v1877_v42 }
 0x3f9   : > { %1878 = vpow2.f32 %v1201_v43 }
 0x3fc   : > { %v1156_v44 = vpop.xlane.xlu1 %1155 }
 0x3fd   : > { %v2572_v45 = vsub.f32 %v2516_v52, %v1156_v44 }
 0x3ff   : > { %v1879_v46 = vpop.eup %1878  ;;  %v1203_v47 = vmul.f32 1.442695, %v2572_v45 }
 0x400   : > { %1233 = vadd.xlane.f32.xlu1 %v1879_v46 }
 0x401   : > { %1880 = vpow2.f32 %v1203_v47 }
 0x404   : > { %v1158_v48 = vpop.xlane.xlu2 %1157 }
 0x405   : > { %v2576_v49 = vsub.f32 %v2519_v54, %v1158_v48 }
 0x407   : > { %v1881_v50 = vpop.eup %1880  ;;  %v1205_v51 = vmul.f32 1.442695, %v2576_v49 }
 0x408   : > { %1235 = vadd.xlane.f32.xlu2 %v1881_v50 }
 0x409   : > { %1882 = vpow2.f32 %v1205_v51 }
 0x40c   : > { %v1160_v53 = vpop.xlane.xlu0 %1159 }
 0x40d   : > { %v2580_v55 = vsub.f32 %v2525_v59, %v1160_v53 }
 0x40f   : > { %v1883_v52 = vpop.eup %1882  ;;  %v1207_v57 = vmul.f32 1.442695, %v2580_v55 }
 0x410   : > { %1237 = vadd.xlane.f32.xlu0 %v1883_v52 }
 0x411   : > { %1884 = vpow2.f32 %v1207_v57 }
 0x413   : > { %v1210_v58 = vpop.xlane.xlu1 %1209 }
 0x414   : > { %1886 = vlog2.f32 %v1210_v58 }
 0x417   : > { %v1885_v60 = vpop.eup %1884 }
 0x418   : > { %1239 = vadd.xlane.f32.xlu1 %v1885_v60 }
 0x41a   : > { %v1887_v54 = vpop.eup %1886 }
 0x41b   : > { %v1242_v62 = vmul.f32 0.6931472, %v1887_v54  ;;  %v1212_v63 = vpop.xlane.xlu2 %1211 }
 0x41c   : > { %1888 = vlog2.f32 %v1212_v63 }
 0x41d   : > { %v1273_v0 = vsub.f32 %v2522_v56, %v1242_v62 }
 0x41f   : > { %1289 = vst [vmem:[%s2585_s21] sm:$0xff] %v1273_v0 }
 0x422   : > { %v1889_v59 = vpop.eup %1888 }
 0x423   : > { %v1244_v2 = vmul.f32 0.6931472, %v1889_v59  ;;  %v1214_v3 = vpop.xlane.xlu0 %1213 }
 0x424   : > { %1890 = vlog2.f32 %v1214_v3 }
 0x425   : > { %v1274_v4 = vsub.f32 %v2528_v61, %v1244_v2 }
 0x427   : > { %1290 = vst [vmem:[%s2585_s21 + $0x8] sm:$0xff] %v1274_v4 }
 0x42a   : > { %v1891_v6 = vpop.eup %1890 }
 0x42b   : > { %v1246_v7 = vmul.f32 0.6931472, %v1891_v6  ;;  %v1216_v8 = vpop.xlane.xlu1 %1215 }
 0x42c   : > { %1892 = vlog2.f32 %v1216_v8 }
 0x42d   : > { %v1275_v56 = vsub.f32 %v2531_v1, %v1246_v7 }
 0x42f   : > { %1291 = vst [vmem:[%s2585_s21 + $0x10] sm:$0xff] %v1275_v56 }
 0x432   : > { %v1893_v10 = vpop.eup %1892 }
 0x433   : > { %v1248_v11 = vmul.f32 0.6931472, %v1893_v10  ;;  %v1218_v12 = vpop.xlane.xlu2 %1217 }
 0x434   : > { %1894 = vlog2.f32 %v1218_v12 }
 0x435   : > { %v1276_v14 = vsub.f32 %v2534_v5, %v1248_v11 }
 0x437   : > { %1292 = vst [vmem:[%s2585_s21 + $0x18] sm:$0xff] %v1276_v14 }
 0x43a   : > { %v1895_v15 = vpop.eup %1894 }
 0x43b   : > { %v1250_v16 = vmul.f32 0.6931472, %v1895_v15  ;;  %v1220_v61 = vpop.xlane.xlu0 %1219 }
 0x43c   : > { %1896 = vlog2.f32 %v1220_v61 }
 0x43d   : > { %v1277_v18 = vsub.f32 %v2537_v9, %v1250_v16 }
 0x43f   : > { %1293 = vst [vmem:[%s2585_s21 + $0x20] sm:$0xff] %v1277_v18 }
 0x442   : > { %v1897_v19 = vpop.eup %1896 }
 0x443   : > { %v1252_v20 = vmul.f32 0.6931472, %v1897_v19  ;;  %v1222_v1 = vpop.xlane.xlu1 %1221 }
 0x444   : > { %1898 = vlog2.f32 %v1222_v1 }
 0x445   : > { %v1278_v22 = vsub.f32 %v2540_v13, %v1252_v20 }
 0x447   : > { %1294 = vst [vmem:[%s2585_s21 + $0x28] sm:$0xff] %v1278_v22 }
 0x44a   : > { %v1899_v23 = vpop.eup %1898 }
 0x44b   : > { %v1254_v25 = vmul.f32 0.6931472, %v1899_v23  ;;  %v1224_v5 = vpop.xlane.xlu2 %1223 }
 0x44c   : > { %1900 = vlog2.f32 %v1224_v5 }
 0x44d   : > { %v1279_v28 = vsub.f32 %v2544_v17, %v1254_v25 }
 0x44f   : > { %1295 = vst [vmem:[%s2585_s21 + $0x30] sm:$0xff] %v1279_v28 }
 0x452   : > { %v1901_v30 = vpop.eup %1900 }
 0x453   : > { %v1256_v31 = vmul.f32 0.6931472, %v1901_v30  ;;  %v1226_v9 = vpop.xlane.xlu0 %1225 }
 0x454   : > { %1902 = vlog2.f32 %v1226_v9 }
 0x455   : > { %v1280_v34 = vsub.f32 %v2548_v21, %v1256_v31 }
 0x457   : > { %1296 = vst [vmem:[%s2585_s21 + $0x38] sm:$0xff] %v1280_v34 }
 0x45a   : > { %v1903_v26 = vpop.eup %1902 }
 0x45b   : > { %v1258_v36 = vmul.f32 0.6931472, %v1903_v26  ;;  %v1228_v13 = vpop.xlane.xlu1 %1227 }
 0x45c   : > { %1904 = vlog2.f32 %v1228_v13 }
 0x45d   : > { %v1281_v35 = vsub.f32 %v2552_v27, %v1258_v36 }
 0x45f   : > { %1297 = vst [vmem:[%s2585_s21 + $0x40] sm:$0xff] %v1281_v35 }
 0x462   : > { %v1905_v29 = vpop.eup %1904 }
 0x463   : > { %v1260_v38 = vmul.f32 0.6931472, %v1905_v29  ;;  %v1230_v17 = vpop.xlane.xlu2 %1229 }
 0x464   : > { %1906 = vlog2.f32 %v1230_v17 }
 0x465   : > { %v1282_v24 = vsub.f32 %v2556_v33, %v1260_v38 }
 0x467   : > { %1298 = vst [vmem:[%s2585_s21 + $0x48] sm:$0xff] %v1282_v24 }
 0x46a   : > { %v1907_v40 = vpop.eup %1906 }
 0x46b   : > { %v1262_v41 = vmul.f32 0.6931472, %v1907_v40  ;;  %v1232_v21 = vpop.xlane.xlu0 %1231 }
 0x46c   : > { %1908 = vlog2.f32 %v1232_v21 }
 0x46d   : > { %v1283_v42 = vsub.f32 %v2560_v37, %v1262_v41 }
 0x46f   : > { %1299 = vst [vmem:[%s2585_s21 + $0x50] sm:$0xff] %v1283_v42 }
 0x472   : > { %v1909_v43 = vpop.eup %1908 }
 0x473   : > { %v1264_v44 = vmul.f32 0.6931472, %v1909_v43  ;;  %v1234_v27 = vpop.xlane.xlu1 %1233 }
 0x474   : > { %1910 = vlog2.f32 %v1234_v27 }
 0x475   : > { %v1284_v46 = vsub.f32 %v2564_v39, %v1264_v44 }
 0x477   : > { %1300 = vst [vmem:[%s2585_s21 + $0x58] sm:$0xff] %v1284_v46 }
 0x47a   : > { %v1911_v47 = vpop.eup %1910 }
 0x47b   : > { %v1266_v33 = vmul.f32 0.6931472, %v1911_v47  ;;  %v1236_v48 = vpop.xlane.xlu2 %1235 }
 0x47c   : > { %1912 = vlog2.f32 %v1236_v48 }
 0x47d   : > { %v1285_v50 = vsub.f32 %v2568_v32, %v1266_v33 }
 0x47f   : > { %1301 = vst [vmem:[%s2585_s21 + $0x60] sm:$0xff] %v1285_v50 }
 0x482   : > { %v1913_v37 = vpop.eup %1912 }
 0x483   : > { %v1268_v51 = vmul.f32 0.6931472, %v1913_v37  ;;  %v1238_v53 = vpop.xlane.xlu0 %1237 }
 0x484   : > { %1914 = vlog2.f32 %v1238_v53 }
 0x485   : > { %v1286_v52 = vsub.f32 %v2572_v45, %v1268_v51 }
 0x487   : > { %1302 = vst [vmem:[%s2585_s21 + $0x68] sm:$0xff] %v1286_v52 }
 0x48a   : > { %v1915_v39 = vpop.eup %1914 }
 0x48b   : > { %v1270_v57 = vmul.f32 0.6931472, %v1915_v39  ;;  %v1240_v58 = vpop.xlane.xlu1 %1239 }
 0x48c   : > { %1916 = vlog2.f32 %v1240_v58 }
 0x48d   : > { %v1287_v60 = vsub.f32 %v2576_v49, %v1270_v57 }
 0x48f   : > { %1303 = vst [vmem:[%s2585_s21 + $0x70] sm:$0xff] %v1287_v60 }
 0x492   : > { %v1917_v32 = vpop.eup %1916 }
 0x493   : > { %v1272_v45 = vmul.f32 0.6931472, %v1917_v32 }
 0x495   : > { %v1288_v54 = vsub.f32 %v2580_v55, %v1272_v45 }
 0x497   : > { %1304 = vst [vmem:[%s2585_s21 + $0x78] sm:$0xff] %v1288_v54 }
 0x498   : > { %2155 = shalt.err (!%p2152_p9)
}
 0x499   : > { %s2216_s30 = smov 128   ;;  %s2217_s9 = smov 8  }
 0x49a   : > { %1769 = dma.vmem_to_hbm [thread:$0]  (%p2370_p4), %s1319_s20, 2048, %s1321_s23, %s1306_s28, %s2216_s30, %s2216_s30, %s2217_s9  }
 0x49b PF: > { %s1335_s21 = sand.u32 1, %s2194_s24   ;;  %p2675_p10 = scmp.ge.s32.totalorder %s2206_s27, 2 }
 0x49c   : > { %s1336_s22 = scalar_lea.sflag [#allocation4], %s1335_s21 }
 0x49d   : > { %p1795_p13 = pnand %p2675_p10, %p2374_p6 }
 0x49f   : > { %p1796_p11 = pneg %p1795_p13 }
 0x4a1   : > { %2189 = dma.done.wait (%p1796_p11), %s1336_s22, 2048  }
 0x4a2   : > { %2191 = vsyncadd (%p1796_p11), %s1336_s22, 4294965248  ;;  %p23_p0 = scmp.ge.s32.totalorder %s2344_s12, 4   ;;  %s2676_s24 = smov %s2198_s25 }
 0x4a3   : > { %s2677_s25 = smov %s2202_s26  ;;  %s2678_s26 = smov %s2355_s13 }
 0x4a4   : > { %s2679_s27 = smov %s2344_s12  ;;  %25 = sbr.rel (!%p23_p0) target bundleno = 11 (0xb), region = 117 }
 0x4a9   :  { %1342 = vsyncpa [#allocation3], 1 }
 0x4aa   :  { %1344 = vsyncpa [#allocation3 + $0x1], 1 }
 0x4ab   :  { %1345 = vsyncpa [#allocation6], 1 }
 0x4ac   :  { %1346 = vsyncpa [#allocation9], 1 }
 0x4ad   :  { %1347 = vsyncpa [#allocation12], 1 }
 0x4ae   :  { %1348 = vsyncpa [#allocation4], 1 }
 0x4af   :  { %1350 = vsyncpa [#allocation4 + $0x1], 1 }

</bundles_post_ra>
